<compile_context>
chip_gen: v7x
topology: tpu7x:2x2x1
jax: 0.10.0
libtpu: 0.0.40
codegen_flags: <defaults>
</compile_context>

<pallas_src>
import functools

import jax
import jax.numpy as jnp
from jax.experimental import pallas as pl
from jax.experimental.pallas import tpu as pltpu


def _style_block_kernel(x_ref, s_ref, sig_ref, w_ref, mask_ref, noise_ref,
                        sn_ref, b_ref, o_ref, patch_ref, *, H, W):
    """One batch sample per grid step.

    x_ref     : (1, I, H*W)   input sample, spatial flattened on lanes
    s_ref     : (1, I, 1)     per-channel style (modulation)
    sig_ref   : (1, OUT, 1)   per-output-channel demodulation factor
    w_ref     : (OUT, 9*I)    fused conv weight, K index = (kh*3+kw)*I + i
    mask_ref  : (9, 1, H*W)   per-tap border masks (zero-padding behaviour)
    noise_ref : (1, 1, H*W)   single-channel noise
    sn_ref    : (1,) SMEM     scale_noise scalar
    b_ref     : (OUT, 1)      output bias
    o_ref     : (1, OUT, H*W) output (lane-dense stores)
    patch_ref : (9*I, H*W)    VMEM scratch: im2col patch matrix
    """
    HW = H * W
    I = x_ref.shape[1]

    # Modulate: x * s  (per input channel, channels on sublanes -> lane broadcast).
    xm = x_ref[0] * s_ref[0]                                   # (I, HW)

    # im2col into VMEM scratch: one lane-roll (XLU) + border mask per tap.
    # patch_t[:, p] = xm[:, p + dh*W + dw] when (h+dh, w+dw) is in-bounds, else 0
    # (zero padding); roll wrap-around at image borders is removed by the mask.
    for kh in range(3):
        for kw in range(3):
            dh, dw = kh - 1, kw - 1
            delta = dh * W + dw
            shifted = xm if delta == 0 else pltpu.roll(xm, (-delta) % HW, axis=1)
            t = kh * 3 + kw
            patch_ref[t * I:(t + 1) * I, :] = shifted * mask_ref[t]

    # Demodulate the (tiny) weight, then a single fused MXU contraction over 9*I.
    w_eff = w_ref[...] * sig_ref[0]                            # (OUT, 9*I)
    acc = jnp.dot(w_eff, patch_ref[...],
                  preferred_element_type=jnp.float32)          # (OUT, HW), lane-dense

    acc = acc + sn_ref[0] * noise_ref[0]                       # noise, bcast over channels
    acc = acc + b_ref[...]                                     # per-channel bias (OUT, 1)
    o_ref[0] = jnp.where(acc >= 0.0, acc, 0.2 * acc)           # LeakyReLU(0.2)


def _style_block_forward(params, x_nchw, w, noise_nchw, *, eps):
    B, I, H, Wd = x_nchw.shape
    O = params["bias"].shape[0]
    HW = H * Wd

    # Style linear (tiny): plain jnp, fused by XLA — no separate pallas_call / HBM trip.
    s = w @ params["style_w"].T + params["style_b"]            # (B, I)
    # Demod factor with the batch-invariant sum_{kh,kw} W^2 hoisted (precomputed).
    sig = jax.lax.rsqrt((s * s) @ params["wsq"] + eps)         # (B, OUT)

    # Per-tap border masks (compile-time constants under jit) — replaces wrapper jnp.pad.
    hh = jnp.arange(H)[:, None]
    ww = jnp.arange(Wd)[None, :]
    masks = []
    for kh in range(3):
        for kw in range(3):
            dh, dw = kh - 1, kw - 1
            m = ((hh + dh >= 0) & (hh + dh < H) &
                 (ww + dw >= 0) & (ww + dw < Wd))
            masks.append(m.reshape(1, HW))
    tap_mask = jnp.stack(masks).astype(jnp.float32)            # (9, 1, HW)

    kern = functools.partial(_style_block_kernel, H=H, W=Wd)

    y = pl.pallas_call(
        kern,
        out_shape=jax.ShapeDtypeStruct((B, O, HW), jnp.float32),
        grid=(B,),
        in_specs=[
            pl.BlockSpec((1, I, HW), lambda b: (b, 0, 0)),      # x, one sample
            pl.BlockSpec((1, I, 1), lambda b: (b, 0, 0)),       # style column
            pl.BlockSpec((1, O, 1), lambda b: (b, 0, 0)),       # demod column
            pl.BlockSpec((O, 9 * I), lambda b: (0, 0)),         # fused conv weight
            pl.BlockSpec((9, 1, HW), lambda b: (0, 0, 0)),      # tap border masks
            pl.BlockSpec((1, 1, HW), lambda b: (b, 0, 0)),      # noise, one sample
            pl.BlockSpec(memory_space=pltpu.MemorySpace.SMEM),  # scale_noise scalar
            pl.BlockSpec((O, 1), lambda b: (0, 0)),             # bias column
        ],
        out_specs=pl.BlockSpec((1, O, HW), lambda b: (b, 0, 0)),
        scratch_shapes=[pltpu.VMEM((9 * I, HW), jnp.float32)],  # im2col patch matrix
        compiler_params=pltpu.CompilerParams(
            dimension_semantics=("parallel",)),                 # 2 steps -> both v7x TCs
    )(x_nchw.reshape(B, I, HW),
      s[:, :, None], sig[:, :, None],
      params["conv_w"], tap_mask,
      noise_nchw.reshape(B, 1, HW),
      params["scale_noise"], params["bias"][:, None])

    return y.reshape(B, O, H, Wd)                              # free reshape, NCHW out


class StyleBlockPallas:
    """JAX/Pallas port of the PyTorch StyleBlock with deterministic init."""

    def __init__(self, w_dim, in_features, out_features, key):
        self.w_dim = w_dim
        self.in_features = in_features
        self.out_features = out_features
        self.eps = 1e-8

        k1, k2 = jax.random.split(key)

        # EqualizedLinear(W_DIM, in_features, bias=1.0)
        c_style = 1.0 / (w_dim ** 0.5)
        self.style_weight = (
            jax.random.normal(k1, (in_features, w_dim), jnp.float32) * c_style)
        self.style_bias = jnp.ones((in_features,), jnp.float32)      # bias = 1.0

        # Conv2dWeightModulate weight: EqualizedWeight([out, in, 3, 3])
        c_conv = 1.0 / ((in_features * 3 * 3) ** 0.5)
        w_conv = (jax.random.normal(k2, (out_features, in_features, 3, 3),
                                    jnp.float32) * c_conv)
        # Fused weight for the single (OUT, 9*I) @ (9*I, H*W) contraction.
        # K index = (kh*3 + kw)*I + i — must match the kernel's im2col tap order.
        self.conv_weight = jnp.transpose(w_conv, (0, 2, 3, 1)).reshape(
            out_features, 9 * in_features)
        # Batch-invariant demod term sum_{kh,kw} W^2, hoisted out of the kernel.
        self.wsq = jnp.sum(w_conv * w_conv, axis=(2, 3)).T           # (I, OUT)

        self.scale_noise = jnp.zeros((1,), jnp.float32)              # zeros, as in __init__
        self.bias = jnp.zeros((out_features,), jnp.float32)

        self._fwd = jax.jit(functools.partial(_style_block_forward, eps=self.eps))

    def __call__(self, x_nchw, w, noise_nchw):
        params = dict(style_w=self.style_weight, style_b=self.style_bias,
                      conv_w=self.conv_weight, wsq=self.wsq,
                      scale_noise=self.scale_noise, bias=self.bias)
        return self._fwd(params, x_nchw, w, noise_nchw)


if __name__ == "__main__":
    key = jax.random.PRNGKey(0)
    kp, kx, kw, kn = jax.random.split(key, 4)

    B, W_DIM, IN, OUT, H, W = 2, 32, 4, 8, 16, 16

    block = StyleBlockPallas(W_DIM, IN, OUT, kp)

    x = jax.random.normal(kx, (B, IN, H, W), jnp.float32)      # NCHW, like PyTorch
    w = jax.random.normal(kw, (B, W_DIM), jnp.float32)
    noise = jax.random.normal(kn, (B, 1, H, W), jnp.float32)   # NCHW single-channel noise

    y = block(x, w, noise)
    jax.block_until_ready(y)
    assert y.shape == (B, OUT, H, W), y.shape
    assert y.dtype == jnp.float32
    print("KERNEL_OK")
</pallas_src>

<mosaic_0001>
module attributes {stable_mosaic.version = 11 : i64} {
  func.func @_style_block_kernel(%arg0: i32, %arg1: memref<1x4x256xf32, #tpu.memory_space<vmem>>, %arg2: memref<1x4x1xf32, #tpu.memory_space<vmem>>, %arg3: memref<1x8x1xf32, #tpu.memory_space<vmem>>, %arg4: memref<8x36xf32, #tpu.memory_space<vmem>>, %arg5: memref<9x1x256xf32, #tpu.memory_space<vmem>>, %arg6: memref<1x1x256xf32, #tpu.memory_space<vmem>>, %arg7: memref<1xf32, #tpu.memory_space<smem>>, %arg8: memref<8x1xf32, #tpu.memory_space<vmem>>, %arg9: memref<1x8x256xf32, #tpu.memory_space<vmem>>, %arg10: memref<36x256xf32, #tpu.memory_space<vmem>>) attributes {dimension_semantics = [#tpu.dimension_semantics<parallel>], iteration_bounds = array<i64: 2>, scalar_prefetch = 0 : i64, scratch_operands = 1 : i64, tpu.core_type = #tpu.core_type<tc>, window_params = [{transform_indices = @transform_0, window_bounds = array<i64: 1, 4, 256>}, {transform_indices = @transform_1, window_bounds = array<i64: 1, 4, 1>}, {transform_indices = @transform_2, window_bounds = array<i64: 1, 8, 1>}, {pipeline_mode = #tpu.pipeline_mode<synchronous>, transform_indices = @transform_3, window_bounds = array<i64: 8, 36>}, {pipeline_mode = #tpu.pipeline_mode<synchronous>, transform_indices = @transform_4, window_bounds = array<i64: 9, 1, 256>}, {transform_indices = @transform_5, window_bounds = array<i64: 1, 1, 256>}, {transform_indices = @transform_6, window_bounds = array<i64: 1>}, {pipeline_mode = #tpu.pipeline_mode<synchronous>, transform_indices = @transform_7, window_bounds = array<i64: 8, 1>}, {transform_indices = @transform_8, window_bounds = array<i64: 1, 8, 256>}]} {
    %c0 = arith.constant 0 : index
    %c0_0 = arith.constant 0 : index
    %c0_1 = arith.constant 0 : index
    %0 = vector.load %arg1[%c0, %c0_0, %c0_1] : memref<1x4x256xf32, #tpu.memory_space<vmem>>, vector<1x4x256xf32>
    %1 = vector.shape_cast %0 : vector<1x4x256xf32> to vector<4x256xf32>
    %c0_2 = arith.constant 0 : index
    %c0_3 = arith.constant 0 : index
    %c0_4 = arith.constant 0 : index
    %2 = vector.load %arg2[%c0_2, %c0_3, %c0_4] : memref<1x4x1xf32, #tpu.memory_space<vmem>>, vector<1x4x1xf32>
    %3 = vector.shape_cast %2 : vector<1x4x1xf32> to vector<4x1xf32>
    %4 = vector.broadcast %3 : vector<4x1xf32> to vector<4x256xf32>
    %5 = arith.mulf %1, %4 : vector<4x256xf32>
    %c17_i32 = arith.constant 17 : i32
    %6 = tpu.dynamic_rotate %5 by %c17_i32 dim 1 : vector<4x256xf32>, i32 -> vector<4x256xf32>
    %c0_5 = arith.constant 0 : index
    %c0_6 = arith.constant 0 : index
    %c0_7 = arith.constant 0 : index
    %7 = vector.load %arg5[%c0_5, %c0_6, %c0_7] : memref<9x1x256xf32, #tpu.memory_space<vmem>>, vector<1x1x256xf32>
    %8 = vector.shape_cast %7 : vector<1x1x256xf32> to vector<1x256xf32>
    %9 = vector.broadcast %8 : vector<1x256xf32> to vector<4x256xf32>
    %10 = arith.mulf %6, %9 : vector<4x256xf32>
    %c0_8 = arith.constant 0 : index
    %c0_9 = arith.constant 0 : index
    %11 = vector.load %arg10[%c0_8, %c0_9] : memref<36x256xf32, #tpu.memory_space<vmem>>, vector<4x256xf32>
    tpu.vector_store %arg10[%c0_8, %c0_9], %10 {strides = array<i32>} : memref<36x256xf32, #tpu.memory_space<vmem>>, vector<4x256xf32>,
    %c16_i32 = arith.constant 16 : i32
    %12 = tpu.dynamic_rotate %5 by %c16_i32 dim 1 : vector<4x256xf32>, i32 -> vector<4x256xf32>
    %c1 = arith.constant 1 : index
    %c0_10 = arith.constant 0 : index
    %c0_11 = arith.constant 0 : index
    %13 = vector.load %arg5[%c1, %c0_10, %c0_11] : memref<9x1x256xf32, #tpu.memory_space<vmem>>, vector<1x1x256xf32>
    %14 = vector.shape_cast %13 : vector<1x1x256xf32> to vector<1x256xf32>
    %15 = vector.broadcast %14 : vector<1x256xf32> to vector<4x256xf32>
    %16 = arith.mulf %12, %15 : vector<4x256xf32>
    %c4 = arith.constant 4 : index
    %c0_12 = arith.constant 0 : index
    %17 = vector.load %arg10[%c4, %c0_12] : memref<36x256xf32, #tpu.memory_space<vmem>>, vector<4x256xf32>
    tpu.vector_store %arg10[%c4, %c0_12], %16 {strides = array<i32>} : memref<36x256xf32, #tpu.memory_space<vmem>>, vector<4x256xf32>,
    %c15_i32 = arith.constant 15 : i32
    %18 = tpu.dynamic_rotate %5 by %c15_i32 dim 1 : vector<4x256xf32>, i32 -> vector<4x256xf32>
    %c2 = arith.constant 2 : index
    %c0_13 = arith.constant 0 : index
    %c0_14 = arith.constant 0 : index
    %19 = vector.load %arg5[%c2, %c0_13, %c0_14] : memref<9x1x256xf32, #tpu.memory_space<vmem>>, vector<1x1x256xf32>
    %20 = vector.shape_cast %19 : vector<1x1x256xf32> to vector<1x256xf32>
    %21 = vector.broadcast %20 : vector<1x256xf32> to vector<4x256xf32>
    %22 = arith.mulf %18, %21 : vector<4x256xf32>
    %c8 = arith.constant 8 : index
    %c0_15 = arith.constant 0 : index
    %23 = vector.load %arg10[%c8, %c0_15] : memref<36x256xf32, #tpu.memory_space<vmem>>, vector<4x256xf32>
    tpu.vector_store %arg10[%c8, %c0_15], %22 {strides = array<i32>} : memref<36x256xf32, #tpu.memory_space<vmem>>, vector<4x256xf32>,
    %c1_i32 = arith.constant 1 : i32
    %24 = tpu.dynamic_rotate %5 by %c1_i32 dim 1 : vector<4x256xf32>, i32 -> vector<4x256xf32>
    %c3 = arith.constant 3 : index
    %c0_16 = arith.constant 0 : index
    %c0_17 = arith.constant 0 : index
    %25 = vector.load %arg5[%c3, %c0_16, %c0_17] : memref<9x1x256xf32, #tpu.memory_space<vmem>>, vector<1x1x256xf32>
    %26 = vector.shape_cast %25 : vector<1x1x256xf32> to vector<1x256xf32>
    %27 = vector.broadcast %26 : vector<1x256xf32> to vector<4x256xf32>
    %28 = arith.mulf %24, %27 : vector<4x256xf32>
    %c12 = arith.constant 12 : index
    %c0_18 = arith.constant 0 : index
    %29 = vector.load %arg10[%c12, %c0_18] : memref<36x256xf32, #tpu.memory_space<vmem>>, vector<4x256xf32>
    tpu.vector_store %arg10[%c12, %c0_18], %28 {strides = array<i32>} : memref<36x256xf32, #tpu.memory_space<vmem>>, vector<4x256xf32>,
    %c4_19 = arith.constant 4 : index
    %c0_20 = arith.constant 0 : index
    %c0_21 = arith.constant 0 : index
    %30 = vector.load %arg5[%c4_19, %c0_20, %c0_21] : memref<9x1x256xf32, #tpu.memory_space<vmem>>, vector<1x1x256xf32>
    %31 = vector.shape_cast %30 : vector<1x1x256xf32> to vector<1x256xf32>
    %32 = vector.broadcast %31 : vector<1x256xf32> to vector<4x256xf32>
    %33 = arith.mulf %5, %32 : vector<4x256xf32>
    %c16 = arith.constant 16 : index
    %c0_22 = arith.constant 0 : index
    %34 = vector.load %arg10[%c16, %c0_22] : memref<36x256xf32, #tpu.memory_space<vmem>>, vector<4x256xf32>
    tpu.vector_store %arg10[%c16, %c0_22], %33 {strides = array<i32>} : memref<36x256xf32, #tpu.memory_space<vmem>>, vector<4x256xf32>,
    %c255_i32 = arith.constant 255 : i32
    %35 = tpu.dynamic_rotate %5 by %c255_i32 dim 1 : vector<4x256xf32>, i32 -> vector<4x256xf32>
    %c5 = arith.constant 5 : index
    %c0_23 = arith.constant 0 : index
    %c0_24 = arith.constant 0 : index
    %36 = vector.load %arg5[%c5, %c0_23, %c0_24] : memref<9x1x256xf32, #tpu.memory_space<vmem>>, vector<1x1x256xf32>
    %37 = vector.shape_cast %36 : vector<1x1x256xf32> to vector<1x256xf32>
    %38 = vector.broadcast %37 : vector<1x256xf32> to vector<4x256xf32>
    %39 = arith.mulf %35, %38 : vector<4x256xf32>
    %c20 = arith.constant 20 : index
    %c0_25 = arith.constant 0 : index
    %40 = vector.load %arg10[%c20, %c0_25] : memref<36x256xf32, #tpu.memory_space<vmem>>, vector<4x256xf32>
    tpu.vector_store %arg10[%c20, %c0_25], %39 {strides = array<i32>} : memref<36x256xf32, #tpu.memory_space<vmem>>, vector<4x256xf32>,
    %c241_i32 = arith.constant 241 : i32
    %41 = tpu.dynamic_rotate %5 by %c241_i32 dim 1 : vector<4x256xf32>, i32 -> vector<4x256xf32>
    %c6 = arith.constant 6 : index
    %c0_26 = arith.constant 0 : index
    %c0_27 = arith.constant 0 : index
    %42 = vector.load %arg5[%c6, %c0_26, %c0_27] : memref<9x1x256xf32, #tpu.memory_space<vmem>>, vector<1x1x256xf32>
    %43 = vector.shape_cast %42 : vector<1x1x256xf32> to vector<1x256xf32>
    %44 = vector.broadcast %43 : vector<1x256xf32> to vector<4x256xf32>
    %45 = arith.mulf %41, %44 : vector<4x256xf32>
    %c24 = arith.constant 24 : index
    %c0_28 = arith.constant 0 : index
    %46 = vector.load %arg10[%c24, %c0_28] : memref<36x256xf32, #tpu.memory_space<vmem>>, vector<4x256xf32>
    tpu.vector_store %arg10[%c24, %c0_28], %45 {strides = array<i32>} : memref<36x256xf32, #tpu.memory_space<vmem>>, vector<4x256xf32>,
    %c240_i32 = arith.constant 240 : i32
    %47 = tpu.dynamic_rotate %5 by %c240_i32 dim 1 : vector<4x256xf32>, i32 -> vector<4x256xf32>
    %c7 = arith.constant 7 : index
    %c0_29 = arith.constant 0 : index
    %c0_30 = arith.constant 0 : index
    %48 = vector.load %arg5[%c7, %c0_29, %c0_30] : memref<9x1x256xf32, #tpu.memory_space<vmem>>, vector<1x1x256xf32>
    %49 = vector.shape_cast %48 : vector<1x1x256xf32> to vector<1x256xf32>
    %50 = vector.broadcast %49 : vector<1x256xf32> to vector<4x256xf32>
    %51 = arith.mulf %47, %50 : vector<4x256xf32>
    %c28 = arith.constant 28 : index
    %c0_31 = arith.constant 0 : index
    %52 = vector.load %arg10[%c28, %c0_31] : memref<36x256xf32, #tpu.memory_space<vmem>>, vector<4x256xf32>
    tpu.vector_store %arg10[%c28, %c0_31], %51 {strides = array<i32>} : memref<36x256xf32, #tpu.memory_space<vmem>>, vector<4x256xf32>,
    %c239_i32 = arith.constant 239 : i32
    %53 = tpu.dynamic_rotate %5 by %c239_i32 dim 1 : vector<4x256xf32>, i32 -> vector<4x256xf32>
    %c8_32 = arith.constant 8 : index
    %c0_33 = arith.constant 0 : index
    %c0_34 = arith.constant 0 : index
    %54 = vector.load %arg5[%c8_32, %c0_33, %c0_34] : memref<9x1x256xf32, #tpu.memory_space<vmem>>, vector<1x1x256xf32>
    %55 = vector.shape_cast %54 : vector<1x1x256xf32> to vector<1x256xf32>
    %56 = vector.broadcast %55 : vector<1x256xf32> to vector<4x256xf32>
    %57 = arith.mulf %53, %56 : vector<4x256xf32>
    %c32 = arith.constant 32 : index
    %c0_35 = arith.constant 0 : index
    %58 = vector.load %arg10[%c32, %c0_35] : memref<36x256xf32, #tpu.memory_space<vmem>>, vector<4x256xf32>
    tpu.vector_store %arg10[%c32, %c0_35], %57 {strides = array<i32>} : memref<36x256xf32, #tpu.memory_space<vmem>>, vector<4x256xf32>,
    %c0_36 = arith.constant 0 : index
    %c0_37 = arith.constant 0 : index
    %59 = vector.load %arg4[%c0_36, %c0_37] : memref<8x36xf32, #tpu.memory_space<vmem>>, vector<8x36xf32>
    %c0_38 = arith.constant 0 : index
    %c0_39 = arith.constant 0 : index
    %c0_40 = arith.constant 0 : index
    %60 = vector.load %arg3[%c0_38, %c0_39, %c0_40] : memref<1x8x1xf32, #tpu.memory_space<vmem>>, vector<1x8x1xf32>
    %61 = vector.shape_cast %60 : vector<1x8x1xf32> to vector<8x1xf32>
    %62 = vector.broadcast %61 : vector<8x1xf32> to vector<8x36xf32>
    %63 = arith.mulf %59, %62 : vector<8x36xf32>
    %c0_41 = arith.constant 0 : index
    %c0_42 = arith.constant 0 : index
    %64 = vector.load %arg10[%c0_41, %c0_42] : memref<36x256xf32, #tpu.memory_space<vmem>>, vector<36x256xf32>
    %cst = arith.constant dense<0.000000e+00> : vector<8x256xf32>
    %65 = tpu.matmul %63, %64, %cst {dimension_numbers = #tpu.dot_dimension_numbers<[1], [0], [0], [1], [0, 0, 1, 1], [], []>} : vector<8x36xf32>, vector<36x256xf32>, vector<8x256xf32> -> vector<8x256xf32>
    %c0_43 = arith.constant 0 : index
    %66 = memref.load %arg7[%c0_43] : memref<1xf32, #tpu.memory_space<smem>>
    %c0_44 = arith.constant 0 : index
    %c0_45 = arith.constant 0 : index
    %c0_46 = arith.constant 0 : index
    %67 = vector.load %arg6[%c0_44, %c0_45, %c0_46] : memref<1x1x256xf32, #tpu.memory_space<vmem>>, vector<1x1x256xf32>
    %68 = vector.shape_cast %67 : vector<1x1x256xf32> to vector<1x256xf32>
    %69 = vector.broadcast %66 : f32 to vector<1x256xf32>
    %70 = arith.mulf %69, %68 : vector<1x256xf32>
    %71 = vector.broadcast %70 : vector<1x256xf32> to vector<8x256xf32>
    %72 = arith.addf %65, %71 : vector<8x256xf32>
    %c0_47 = arith.constant 0 : index
    %c0_48 = arith.constant 0 : index
    %73 = vector.load %arg8[%c0_47, %c0_48] : memref<8x1xf32, #tpu.memory_space<vmem>>, vector<8x1xf32>
    %74 = vector.broadcast %73 : vector<8x1xf32> to vector<8x256xf32>
    %75 = arith.addf %72, %74 : vector<8x256xf32>
    %cst_49 = arith.constant 0.000000e+00 : f32
    %76 = vector.broadcast %cst_49 : f32 to vector<8x256xf32>
    %77 = arith.cmpf oge, %75, %76 : vector<8x256xf32>
    %cst_50 = arith.constant 2.000000e-01 : f32
    %78 = vector.broadcast %cst_50 : f32 to vector<8x256xf32>
    %79 = arith.mulf %78, %75 : vector<8x256xf32>
    %80 = arith.select %77, %75, %79 : vector<8x256xi1>, vector<8x256xf32>
    %c0_51 = arith.constant 0 : index
    %c0_52 = arith.constant 0 : index
    %c0_53 = arith.constant 0 : index
    %81 = vector.load %arg9[%c0_51, %c0_52, %c0_53] : memref<1x8x256xf32, #tpu.memory_space<vmem>>, vector<1x8x256xf32>
    %82 = vector.shape_cast %81 : vector<1x8x256xf32> to vector<8x256xf32>
    %83 = vector.shape_cast %80 : vector<8x256xf32> to vector<1x8x256xf32>
    tpu.vector_store %arg9[%c0_51, %c0_52, %c0_53], %83 {strides = array<i32>} : memref<1x8x256xf32, #tpu.memory_space<vmem>>, vector<1x8x256xf32>,
    return
  }
  func.func @transform_0(%arg0: i32) -> (i32, i32, i32) {
    %c0_i32 = arith.constant 0 : i32
    %c0_i32_0 = arith.constant 0 : i32
    %c0_i32_1 = arith.constant 0 : i32
    return %arg0, %c0_i32, %c0_i32_0 : i32, i32, i32
  }
  func.func @transform_1(%arg0: i32) -> (i32, i32, i32) {
    %c0_i32 = arith.constant 0 : i32
    %c0_i32_0 = arith.constant 0 : i32
    %c0_i32_1 = arith.constant 0 : i32
    return %arg0, %c0_i32, %c0_i32_0 : i32, i32, i32
  }
  func.func @transform_2(%arg0: i32) -> (i32, i32, i32) {
    %c0_i32 = arith.constant 0 : i32
    %c0_i32_0 = arith.constant 0 : i32
    %c0_i32_1 = arith.constant 0 : i32
    return %arg0, %c0_i32, %c0_i32_0 : i32, i32, i32
  }
  func.func @transform_3(%arg0: i32) -> (i32, i32) {
    %c0_i32 = arith.constant 0 : i32
    %c0_i32_0 = arith.constant 0 : i32
    %c0_i32_1 = arith.constant 0 : i32
    return %c0_i32, %c0_i32_0 : i32, i32
  }
  func.func @transform_4(%arg0: i32) -> (i32, i32, i32) {
    %c0_i32 = arith.constant 0 : i32
    %c0_i32_0 = arith.constant 0 : i32
    %c0_i32_1 = arith.constant 0 : i32
    %c0_i32_2 = arith.constant 0 : i32
    return %c0_i32, %c0_i32_0, %c0_i32_1 : i32, i32, i32
  }
  func.func @transform_5(%arg0: i32) -> (i32, i32, i32) {
    %c0_i32 = arith.constant 0 : i32
    %c0_i32_0 = arith.constant 0 : i32
    %c0_i32_1 = arith.constant 0 : i32
    return %arg0, %c0_i32, %c0_i32_0 : i32, i32, i32
  }
  func.func @transform_6(%arg0: i32) -> i32 {
    %c0_i32 = arith.constant 0 : i32
    %c0_i32_0 = arith.constant 0 : i32
    return %c0_i32 : i32
  }
  func.func @transform_7(%arg0: i32) -> (i32, i32) {
    %c0_i32 = arith.constant 0 : i32
    %c0_i32_0 = arith.constant 0 : i32
    %c0_i32_1 = arith.constant 0 : i32
    return %c0_i32, %c0_i32_0 : i32, i32
  }
  func.func @transform_8(%arg0: i32) -> (i32, i32, i32) {
    %c0_i32 = arith.constant 0 : i32
    %c0_i32_0 = arith.constant 0 : i32
    %c0_i32_1 = arith.constant 0 : i32
    return %arg0, %c0_i32, %c0_i32_0 : i32, i32, i32
  }
}

</mosaic_0001>

<bundles_post_ra>
// kernel: _style_block_forward.1
= control target key start
LH: loop header
LB: loop body
LE: loop exit
PB: predicated region body
PF: predicated region fallthrough
CT: control target
= control target key end

     0   :  { %s957_s29 = smov 0   ;;  %s1076_s0 = inlined_call_operand.vmem [shape: f32[2,4,256], index: 0, kind: input, shape index: {}]   ;;  %s1077_s1 = inlined_call_operand.vmem [shape: f32[2,4,1], index: 1, kind: input, shape index: {}]   ;;  %s1078_s2 = inlined_call_operand.vmem [shape: f32[2,8,1], index: 2, kind: input, shape index: {}]   ;;  %s1079_s3 = inlined_call_operand.vmem [shape: f32[8,36], index: 3, kind: input, shape index: {}]   ;;  %s1080_s4 = inlined_call_operand.vmem [shape: f32[9,1,256], index: 4, kind: input, shape index: {}]   ;;  %s1081_s5 = inlined_call_operand.vmem [shape: f32[2,1,256], index: 5, kind: input, shape index: {}]   ;;  %s1082_s6 = inlined_call_operand.<no memory space> [shape: f32[1], index: 6, kind: input, shape index: {}]   ;;  %s1083_s7 = inlined_call_operand.vmem [shape: f32[8,1], index: 7, kind: input, shape index: {}]   ;;  %s1084_s8 = inlined_call_operand.vmem [shape: f32[2,8,256], index: 8, kind: output, shape index: {}]  }
   0x1   :  { %13 = sst [smem:[#allocation3]] %s1082_s6 }
   0x2 LB: > { %s834_s30 = sadd.s32 4294967295, %s896_s29   ;;  %p838_p0 = scmp.ge.s32.totalorder %s896_s29, 1  ;;  %s896_s29 = sphi %s957_s29, %s19_s29  }
   0x3   : > { %p290_p1 = scmp.lt.s32.totalorder %s896_s29, 3 }
   0x5   : > { %p291_p2 = pnand %p838_p0, %p290_p1 }
   0x6   : > { %p336_p3 = scmp.lt.s32.totalorder (!%p291_p2), %s834_s30, 1  ;;  %v898_v0 = vmov (!%p291_p2), 0   ;;  %v367_v2 = vlaneseq (!%p291_p2)  ;;  %v899_v3 = vmov (!%p291_p2), 839922192   ;;  %v849_v9 = vld [vmem:[%s1080_s4 + $0x8] sm:$0x3] (!%p291_p2) }
   0x7   : > { %294 = sbr.rel (%p291_p2) target bundleno = 533 (0x215), region = 52  ;;  %888 = vset.pattern.permute.xlu0 (!%p291_p2), %v898_v0  ;;  %889 = vset.pattern.permute.xlu1 (!%p291_p2), %v898_v0  ;;  %v365_v4 = vunpack.c.l.s4 (!%p291_p2), %v899_v3  ;;  %s900_s18 = smov (!%p291_p2), 1   ;;  %v727_v21 = vld [vmem:[%s1083_s7] sm:$0xff] (!%p291_p2)  ;;  %v908_v23 = vmov (!%p291_p2), 0.0   ;;  %v850_v46 = vld [vmem:[%s1080_s4 + $0xa] sm:$0x3] (!%p291_p2) }
   0x8   : > { %v368_v5 = vshrl.u32 (!%p291_p2), %v367_v2, 7  ;;  %s901_s19 = smov (!%p291_p2), 16   ;;  %s902_s20 = smov (!%p291_p2), 17   ;;  %720 = vmatprep.mubr.f32.mxu0 (!%p291_p2), %v908_v23  ;;  %v994_v24 = vand.u32 (!%p291_p2), 127, %v367_v2  ;;  %v848_v25 = vld [vmem:[%s1080_s4 + $0x6] sm:$0x3] (!%p291_p2) }
   0x9   : > { %v366_v6 = vunpack.c.0.s8 (!%p291_p2), %v365_v4  ;;  %s903_s21 = smov (!%p291_p2), 15   ;;  %s904_s22 = smov (!%p291_p2), 127   ;;  %v385_v30 = vld [vmem:[%s1080_s4] sm:$0x3] (!%p291_p2)  ;;  %v847_v39 = vld [vmem:[%s1080_s4 + $0x4] sm:$0x3] (!%p291_p2) }
   0xa   : > { %v971_v7 = vsub.s32 (!%p291_p2), 0, %v368_v5  ;;  %v973_v8 = vsub.s32 (!%p291_p2), 1, %v368_v5  ;;  %s905_s23 = smov (!%p291_p2), 112   ;;  %s906_s24 = smov (!%p291_p2), 113   ;;  %vm459_vm0 = vcmp.lt.s32.totalorder (!%p291_p2), %v994_v24, 1  ;;  %vm382_vm1 = vcmp.lt.s32.totalorder (!%p291_p2), %v994_v24, 17 }
   0xb   : > { %v369_v10 = vsub.s32 (!%p291_p2), %v366_v6, %v368_v5  ;;  %s907_s28 = smov (!%p291_p2), 111   ;;  %vm435_vm2 = vcmp.lt.s32.totalorder (!%p291_p2), %v994_v24, 15  ;;  %v846_v51 = vld [vmem:[%s1080_s4 + $0x2] sm:$0x3] (!%p291_p2)  ;;  %vm508_vm3 = vcmp.lt.s32.totalorder (!%p291_p2), %v994_v24, 127  ;;  %vm405_vm4 = vcmp.lt.s32.totalorder (!%p291_p2), %v994_v24, 16 }
   0xc   : > { %v491_v11 = vrot.slane (!%p291_p2), %v849_v9, %v971_v7  ;;  %v495_v12 = vrot.slane (!%p291_p2), %v849_v9, %v973_v8  ;;  %v468_v28 = vrot.slane (!%p291_p2), %v848_v25, %v971_v7  ;;  %v472_v29 = vrot.slane (!%p291_p2), %v848_v25, %v973_v8  ;;  %v852_v58 = vld [vmem:[%s1080_s4 + $0xe] sm:$0x3] (!%p291_p2) }
   0xd   : > { %v390_v37 = vrot.slane (!%p291_p2), %v385_v30, %v971_v7  ;;  %v394_v38 = vrot.slane (!%p291_p2), %v385_v30, %v973_v8  ;;  %v444_v49 = vrot.slane (!%p291_p2), %v847_v39, %v971_v7  ;;  %v448_v50 = vrot.slane (!%p291_p2), %v847_v39, %v973_v8 }
   0xe   : > { %s1086_s30 = smov (!%p336_p3, %s834_s30), 1  ;;  %v496_v16 = vcombine.low %v491_v11, %v495_v12  ;;  %v517_v54 = vrot.slane %v850_v46, %v971_v7  ;;  %v521_v57 = vrot.slane %v850_v46, %v973_v8  ;;  %v414_v61 = vrot.slane %v846_v51, %v971_v7 }
   0xf   : > { %s841_s6 = sshll.u32 %s1086_s30, 2  ;;  %s859_s12 = sshll.u32 %s1086_s30, 3  ;;  %v418_v62 = vrot.slane %v846_v51, %v973_v8  ;;  %vm562_vm5 = vcmp.lt.s32.totalorder %v994_v24, 112  ;;  %v575_v2 = vrot.slane %v852_v58, %v973_v8  ;;  %vm538_vm6 = vcmp.lt.s32.totalorder %v994_v24, 113 }
  0x10   : > { %s344_s11 = scalar_lea.vmem %s1077_s1, %s841_s6  ;;  %s340_s17 = scalar_lea.vmem %s1076_s0, %s859_s12  ;;  %vm592_vm7 = vcmp.lt.s32.totalorder %v994_v24, 111  ;;  %vm649_vm8 = vcmask 1043456   ;;  %vm645_vm9 = vcmask 293888  }
  0x11   : > { %v359_v1 = vld [vmem:[%s344_s11] sm:$0xf]  ;;  %s348_s27 = scalar_lea.vmem %s1078_s2, %s859_s12  ;;  %s843_s6 = sshll.u32 %s1086_s30, 1 }
  0x12   : > { %362 = vperm.xlu0 %888, %v359_v1   ;;  %v358_v14 = vld [vmem:[%s340_s17] sm:$0xff]  ;;  %v571_v1 = vrot.slane %v852_v58, %v971_v7  ;;  %s352_s11 = scalar_lea.vmem %s1081_s5, %s843_s6  ;;  %s860_s12 = sshll.u32 %s1086_s30, 4 }
  0x13   : > { %v613_v22 = vld [vmem:[%s348_s27] sm:$0xff]  ;;  %s357_s15 = scalar_lea.vmem %s1084_s8, %s860_s12 }
  0x91   : > { %v363_v13 = vpop.permute.xlu0 %362 }
  0x92   : > { %v370_v15 = vrot.slane %v363_v13, %v369_v10  ;;  %v851_v13 = vld [vmem:[%s1080_s4 + $0xc] sm:$0x3] }
  0x93   : > { %v547_v25 = vrot.slane %v851_v13, %v971_v7 }
  0x94   : > { %v372_v17 = vmul.f32 %v370_v15, %v358_v14 }
  0x96   : > { %455 = vrot.lane.b32.xlu1 %v372_v17, %s900_s18  ;;  %401 = vrot.lane.b32.xlu0 %v372_v17, %s901_s19  ;;  %v498_v18 = vmul.f32 %v496_v16, %v372_v17  ;;  %v374_v19 = vcombine.high %v372_v17, %v372_v17 }
  0x98   : > { %502 = vst [vmem:[#allocation2 + $0x20] sm:$0xf] %v498_v18  ;;  %v500_v20 = vcombine.high %v498_v18, %v498_v18 }
  0x9a   : > { %376 = vrot.lane.b32.xlu1 %v372_v17, %s902_s20  ;;  %457 = vrot.lane.b32.xlu0 %v374_v19, %s900_s18  ;;  %503 = vst [vmem:[#allocation2 + $0x28] sm:$0xf] %v500_v20 }
  0x9e   : > { %431 = vrot.lane.b32.xlu1 %v372_v17, %s903_s21  ;;  %378 = vrot.lane.b32.xlu0 %v374_v19, %s902_s20 }
  0xa2   : > { %504 = vrot.lane.b32.xlu1 %v372_v17, %s904_s22  ;;  %433 = vrot.lane.b32.xlu0 %v374_v19, %s903_s21 }
  0xa6   : > { %506 = vrot.lane.b32.xlu0 %v374_v19, %s904_s22  ;;  %403 = vrot.lane.b32.xlu1 %v374_v19, %s901_s19 }
  0xaa   : > { %560 = vrot.lane.b32.xlu0 %v374_v19, %s905_s23  ;;  %558 = vrot.lane.b32.xlu1 %v372_v17, %s905_s23 }
  0xae   : > { %536 = vrot.lane.b32.xlu0 %v374_v19, %s906_s24  ;;  %534 = vrot.lane.b32.xlu1 %v372_v17, %s906_s24 }
  0xb2   : > { %590 = vrot.lane.b32.xlu0 %v374_v19, %s907_s28  ;;  %588 = vrot.lane.b32.xlu1 %v372_v17, %s907_s28  ;;  %s630_s28 = sld [smem:[#allocation3]] }
  0xb6   : > { %730 = vperm.xlu0 %888, %v727_v21   ;;  %616 = vperm.xlu1 %889, %v613_v22  }
 0x108   : > { %v456_v26 = vpop.permute.xlu1 %455  ;;  %v402_v27 = vpop.permute.xlu0 %401 }
 0x10c   : > { %v377_v31 = vpop.permute.xlu1 %376  ;;  %v458_v32 = vpop.permute.xlu0 %457 }
 0x10d   : > { %v460_v33 = vsel %vm459_vm0, %v456_v26, %v458_v32  ;;  %v461_v34 = vsel %vm459_vm0, %v458_v32, %v456_v26  ;;  %v551_v26 = vrot.slane %v851_v13, %v973_v8 }
 0x10e   : > { %v475_v35 = vmul.f32 %v468_v28, %v461_v34  ;;  %v476_v36 = vmul.f32 %v472_v29, %v460_v33 }
 0x110   : > { %v479_v40 = vrot.slane %v475_v35, 4  ;;  %v480_v41 = vrot.slane %v476_v36, 4  ;;  %v432_v42 = vpop.permute.xlu1 %431  ;;  %v379_v43 = vpop.permute.xlu0 %378 }
 0x111   : > { %v383_v44 = vsel %vm382_vm1, %v377_v31, %v379_v43  ;;  %v384_v45 = vsel %vm382_vm1, %v379_v43, %v377_v31 }
 0x112   : > { %483 = vst [vmem:[#allocation2 + $0x10] sm:$0xf0] %v479_v40  ;;  %484 = vst [vmem:[#allocation2 + $0x18] sm:$0xf0] %v480_v41  ;;  %v397_v47 = vmul.f32 %v390_v37, %v384_v45  ;;  %v398_v48 = vmul.f32 %v394_v38, %v383_v44 }
 0x114   : > { %399 = vst [vmem:[#allocation2] sm:$0xf] %v397_v47  ;;  %400 = vst [vmem:[#allocation2 + $0x8] sm:$0xf] %v398_v48  ;;  %v505_v52 = vpop.permute.xlu1 %504  ;;  %v434_v53 = vpop.permute.xlu0 %433 }
 0x115   : > { %v436_v55 = vsel %vm435_vm2, %v432_v42, %v434_v53  ;;  %v437_v56 = vsel %vm435_vm2, %v434_v53, %v432_v42 }
 0x116   : > { %v451_v59 = vmul.f32 %v444_v49, %v437_v56  ;;  %v452_v60 = vmul.f32 %v448_v50, %v436_v55 }
 0x118   : > { %453 = vst [vmem:[#allocation2 + $0x10] sm:$0xf] %v451_v59  ;;  %454 = vst [vmem:[#allocation2 + $0x18] sm:$0xf] %v452_v60  ;;  %v507_v63 = vpop.permute.xlu0 %506  ;;  %v404_v0 = vpop.permute.xlu1 %403  ;;  %v631_v60 = vld [vmem:[%s352_s11] sm:$0x3] }
 0x119   : > { %v509_v3 = vsel %vm508_vm3, %v505_v52, %v507_v63  ;;  %v510_v4 = vsel %vm508_vm3, %v507_v63, %v505_v52  ;;  %v406_v5 = vsel %vm405_vm4, %v402_v27, %v404_v0  ;;  %v407_v6 = vsel %vm405_vm4, %v404_v0, %v402_v27  ;;  %v853_v27 = vld [vmem:[%s1080_s4 + $0x10] sm:$0x3] }
 0x11a   : > { %v524_v9 = vmul.f32 %v517_v54, %v509_v3  ;;  %v525_v10 = vmul.f32 %v521_v57, %v510_v4  ;;  %v421_v11 = vmul.f32 %v414_v61, %v407_v6  ;;  %v422_v12 = vmul.f32 %v418_v62, %v406_v5  ;;  %v612_v57 = vld [vmem:[%s1079_s3] sm:$0xff] }
 0x11b   : > { %v601_v36 = vrot.slane %v853_v27, %v971_v7  ;;  %v605_v37 = vrot.slane %v853_v27, %v973_v8  ;;  %v632_v61 = vstv %s630_s28 }
 0x11c   : > { %v528_v14 = vrot.slane %v524_v9, 4  ;;  %v529_v15 = vrot.slane %v525_v10, 4  ;;  %v425_v16 = vrot.slane %v421_v11, 4  ;;  %v426_v17 = vrot.slane %v422_v12, 4  ;;  %v561_v18 = vpop.permute.xlu0 %560  ;;  %v559_v19 = vpop.permute.xlu1 %558 }
 0x11d   : > { %v563_v20 = vsel %vm562_vm5, %v559_v19, %v561_v18  ;;  %v564_v21 = vsel %vm562_vm5, %v561_v18, %v559_v19  ;;  %v633_v62 = vmul.f32 %v632_v61, %v631_v60 }
 0x11e   : > { %532 = vst [vmem:[#allocation2 + $0x20] sm:$0xf0] %v528_v14  ;;  %533 = vst [vmem:[#allocation2 + $0x28] sm:$0xf0] %v529_v15  ;;  %v578_v22 = vmul.f32 %v571_v1, %v563_v20  ;;  %v579_v23 = vmul.f32 %v575_v2, %v564_v21 }
 0x11f   : > { %429 = vst [vmem:[#allocation2] sm:$0xf0] %v425_v16  ;;  %430 = vst [vmem:[#allocation2 + $0x8] sm:$0xf0] %v426_v17  ;;  %v623_v40 = vld [vmem:[#allocation2 + $0x18] sm:$0xff]  ;;  %v622_v45 = vld [vmem:[#allocation2 + $0x10] sm:$0xff]  ;;  %v638_v63 = vrot.slane %v633_v62, %v971_v7  ;;  %v642_v0 = vrot.slane %v633_v62, %v973_v8 }
 0x120   : > { %v582_v28 = vrot.slane %v578_v22, 4  ;;  %v583_v29 = vrot.slane %v579_v23, 4  ;;  %v537_v30 = vpop.permute.xlu0 %536  ;;  %v535_v31 = vpop.permute.xlu1 %534 }
 0x121   : > { %v539_v32 = vsel %vm538_vm6, %v535_v31, %v537_v30  ;;  %v540_v33 = vsel %vm538_vm6, %v537_v30, %v535_v31 }
 0x122   : > { %586 = vst [vmem:[#allocation2 + $0x30] sm:$0xf0] %v582_v28  ;;  %587 = vst [vmem:[#allocation2 + $0x38] sm:$0xf0] %v583_v29  ;;  %v554_v34 = vmul.f32 %v547_v25, %v539_v32  ;;  %v555_v35 = vmul.f32 %v551_v26, %v540_v33 }
 0x124   : > { %556 = vst [vmem:[#allocation2 + $0x30] sm:$0xf] %v554_v34  ;;  %557 = vst [vmem:[#allocation2 + $0x38] sm:$0xf] %v555_v35  ;;  %v591_v38 = vpop.permute.xlu0 %590  ;;  %v589_v39 = vpop.permute.xlu1 %588 }
 0x125   : > { %v593_v41 = vsel %vm592_vm7, %v589_v39, %v591_v38  ;;  %v594_v42 = vsel %vm592_vm7, %v591_v38, %v589_v39  ;;  %v625_v49 = vld [vmem:[#allocation2 + $0x28] sm:$0xff]  ;;  %v624_v51 = vld [vmem:[#allocation2 + $0x20] sm:$0xff] }
 0x126   : > { %v621_v43 = vld [vmem:[#allocation2 + $0x8] sm:$0xff]  ;;  %v620_v44 = vld [vmem:[#allocation2] sm:$0xff]  ;;  %v608_v46 = vmul.f32 %v601_v36, %v593_v41  ;;  %v609_v24 = vmul.f32 %v605_v37, %v594_v42 }
 0x127   : > { %v861_v47 = vpack.c.bf16 %v623_v40, %v621_v43  ;;  %v863_v48 = vpack.c.bf16 %v622_v45, %v620_v44 }
 0x128   : > { %610 = vst [vmem:[#allocation2 + $0x40] sm:$0xf] %v608_v46  ;;  %611 = vst [vmem:[#allocation2 + $0x48] sm:$0xf] %v609_v24 }
 0x129   : > { %862 = vmatprep.subr.bf16.mxu0 %v861_v47 }
 0x12a   : > { %864 = vmatpush1.bf16.msra.mxu0 %v863_v48 }
 0x12b   : > { %v627_v50 = vld [vmem:[#allocation2 + $0x38] sm:$0xff]  ;;  %v626_v52 = vld [vmem:[#allocation2 + $0x30] sm:$0xff] }
 0x12c   : > { %v865_v53 = vpack.c.bf16 %v627_v50, %v625_v49  ;;  %v867_v54 = vpack.c.bf16 %v626_v52, %v624_v51 }
 0x12e   : > { %866 = vmatprep.subr.bf16.mxu0 %v865_v53 }
 0x12f   : > { %868 = vmatpush1.bf16.msra.mxu0 %v867_v54  ;;  %v629_v55 = vld [vmem:[#allocation2 + $0x48] sm:$0xf]  ;;  %v628_v56 = vld [vmem:[#allocation2 + $0x40] sm:$0xf] }
 0x130   : > { %854 = vmatprep.subr.msk.mxu0 %vm649_vm8, %v629_v55 }
 0x133   : > { %855 = vmatpush1.msk.msra.mxu0 %vm649_vm8, %v628_v56 }
 0x135   : > { %v617_v58 = vpop.permute.xlu1 %616  ;;  %v731_v4 = vpop.permute.xlu0 %730 }
 0x136   : > { %v619_v59 = vmul.f32 %v617_v58, %v612_v57 }
 0x138   : > { %856 = vmatmul.mubr.msk.f32.vlgmr.msra.gmra.mrb[0].mxu0 %vm645_vm9, %v619_v59 }
 0x20b   : > { %v722_v1 = vpop.f32.mrb[0].mxu0 }
 0x20c   : > { %v723_v2 = vadd.f32 %v722_v1, %v638_v63  ;;  %v724_v3 = vpop.f32.mrb[1].mxu0 }
 0x20d   : > { %v725_v5 = vadd.f32 %v724_v3, %v642_v0 }
 0x20e   : > { %v733_v6 = vadd.f32 %v731_v4, %v723_v2 }
 0x20f   : > { %v734_v9 = vadd.f32 %v731_v4, %v725_v5 }
 0x210   : > { %vm735_vm10 = vcmp.ge.f32.partialorder %v733_v6, 0.0  ;;  %v737_v10 = vmul.f32 0.2, %v733_v6 }
 0x211   : > { %vm736_vm11 = vcmp.ge.f32.partialorder %v734_v9, 0.0  ;;  %v738_v11 = vmul.f32 0.2, %v734_v9 }
 0x212   : > { %v739_v12 = vsel %vm735_vm10, %v733_v6, %v737_v10 }
 0x213   : > { %741 = vst [vmem:[%s357_s15] sm:$0xff] %v739_v12  ;;  %v740_v7 = vsel %vm736_vm11, %v734_v9, %v738_v11 }
 0x214   : > { %742 = vst [vmem:[%s357_s15 + $0x8] sm:$0xff] %v740_v7 }
 0x215 PF: > { %s19_s29 = sadd.s32 1, %s896_s29  }
 0x216   : > { %p16_p4 = scmp.ge.s32.totalorder %s19_s29, 4  }
 0x218   :  { %18 = sbr.rel (!%p16_p4) target bundleno = 2 (0x2), region = 99 }

</bundles_post_ra>
